<compile_context>
chip_gen: v5e
topology: v5e:2x2
jax: 0.10.0
libtpu: 0.0.40
codegen_flags: <defaults>
</compile_context>

<pallas_src>
import functools
import math

import jax
import jax.numpy as jnp
import numpy as np
from jax import lax
from jax.experimental import pallas as pl
from jax.experimental.pallas import tpu as pltpu


# ----------------------------------------------------------------- utilities

def _pick_tile(dim, target, align, min_align=None):
    """Largest divisor of `dim` that is a multiple of an alignment (starting at
    `align`, relaxing down to `min_align`) and <= `target`.

    Falls back to the full dimension (always a legal BlockSpec block). Note:
    for awkward (prime-ish) large dims this means a full-extent block; callers
    should keep an eye on VMEM for such shapes."""
    if dim <= target:
        return dim
    if min_align is None:
        min_align = align
    a = align
    while a >= min_align:
        t = (target // a) * a
        while t >= a:
            if dim % t == 0:
                return t
            t -= a
        a //= 2
    return dim


def _pick_heads_per_step(H, hd, C):
    """Heads processed per attention grid step.

    Smallest divisor of H such that the (hb*hd)-wide output slab is lane-dense
    (>=128 lanes when possible) and legal as a last-dim block (a multiple of
    128 lanes, or the full C).  Keeping hb minimal bounds the static per-head
    unroll (hb == 2 for VAR's head_dim == 64)."""
    target = max(1, 128 // hd)
    for hb in range(target, H + 1):
        if H % hb == 0 and ((hb * hd) % 128 == 0 or hb * hd == C):
            return hb
    return H


def _vmem_limit_bytes():
    """Generation-aware scoped-VMEM limit: ~3/4 of physical per-core VMEM
    (96 MiB on v5e/v6e, 48 MiB on v7x), conservative fallback otherwise."""
    try:
        cap = getattr(pltpu.get_tpu_info(), "vmem_capacity_bytes", None)
    except Exception:
        cap = None
    if not cap:
        return 48 * 1024 * 1024
    return int(min(cap * 3 // 4, 100 * 1024 * 1024))


# ------------------------------------------------------------------- kernels

def _qkv_kernel(x_ref, w_ref, b_ref, o_ref, acc_ref, *, C):
    # x_ref: (TL, TCK) bf16, w_ref: (TCK, 3C) bf16 (input-major, q-scale folded)
    # b_ref: (3, 1, C) f32, o_ref: (3, TL, C) bf16, acc_ref: (TL, 3C) f32
    kc = pl.program_id(2)

    @pl.when(kc == 0)
    def _init():
        acc_ref[...] = jnp.zeros(acc_ref.shape, acc_ref.dtype)

    acc_ref[...] += jnp.dot(x_ref[...], w_ref[...],
                            preferred_element_type=jnp.float32)

    @pl.when(kc == pl.num_programs(2) - 1)
    def _store():
        acc = acc_ref[...]
        for j in range(3):
            o_ref[j] = (acc[:, j * C:(j + 1) * C] + b_ref[j]).astype(o_ref.dtype)


def _proj_kernel(x_ref, w_ref, b_ref, o_ref, acc_ref):
    # x_ref: (TL, TCK) bf16, w_ref: (TCK, C) bf16 (input-major), b_ref: (1, C)
    # f32, o_ref: (TL, C) out_dtype, acc_ref: (TL, C) f32
    kc = pl.program_id(2)

    @pl.when(kc == 0)
    def _init():
        acc_ref[...] = jnp.zeros(acc_ref.shape, acc_ref.dtype)

    acc_ref[...] += jnp.dot(x_ref[...], w_ref[...],
                            preferred_element_type=jnp.float32)

    @pl.when(kc == pl.num_programs(2) - 1)
    def _store():
        o_ref[...] = (acc_ref[...] + b_ref[...]).astype(o_ref.dtype)


def _attn_kernel(q_ref, k_ref, v_ref, bias_ref, o_ref, m_ref, l_ref, acc_ref,
                 *, hd, hb):
    # One grid step = (batch, head-group, q-tile, kv-tile).
    # q_ref: (TQ, hb*hd)  k_ref/v_ref: (TK, hb*hd) bf16  bias_ref: (TQ, TK) bf16
    # o_ref: (TQ, hb*hd)  scratch (head-major): m/l (hb, TQ, 1) f32,
    #                                           acc (hb, TQ, hd) f32
    ki = pl.program_id(3)

    @pl.when(ki == 0)
    def _init():
        m_ref[...] = jnp.full(m_ref.shape, -jnp.inf, m_ref.dtype)
        l_ref[...] = jnp.zeros(l_ref.shape, l_ref.dtype)
        acc_ref[...] = jnp.zeros(acc_ref.shape, acc_ref.dtype)

    bias = bias_ref[...].astype(jnp.float32)                  # (TQ, TK) f32 add
    for h in range(hb):                                       # short static unroll
        c0 = h * hd
        qh = q_ref[:, c0:c0 + hd]                             # bf16, scale folded
        kh = k_ref[:, c0:c0 + hd]
        vh = v_ref[:, c0:c0 + hd]
        # q @ k^T as an NT contraction -- no transpose materialized.
        s = lax.dot_general(qh, kh, (((1,), (1,)), ((), ())),
                            preferred_element_type=jnp.float32) + bias
        m_prev = m_ref[h]                                     # (TQ, 1)
        m_new = jnp.maximum(m_prev, jnp.max(s, axis=-1, keepdims=True))
        alpha = jnp.exp(m_prev - m_new)                       # f32 rescale
        # bf16 exponentials (EUP); statistics stay in f32.
        p = jnp.exp((s - m_new).astype(jnp.bfloat16))
        l_ref[h] = alpha * l_ref[h] + jnp.sum(p.astype(jnp.float32), axis=-1,
                                              keepdims=True)
        acc_ref[h] = alpha * acc_ref[h] + jnp.dot(
            p, vh, preferred_element_type=jnp.float32)
        m_ref[h] = m_new

    @pl.when(ki == pl.num_programs(3) - 1)
    def _finalize():
        for h in range(hb):
            inv_l = pl.reciprocal(l_ref[h], approx=True)      # EUP slot
            o_ref[:, h * hd:(h + 1) * hd] = (acc_ref[h] * inv_l).astype(o_ref.dtype)


# ------------------------------------------------------------------- wrapper

def self_attention_forward(x, attn_bias, params, num_heads, out_dtype=None):
    """Pallas TPU implementation of SelfAttention.forward (slow_attn path)."""
    B, L, C = x.shape
    H = num_heads
    assert C % H == 0
    hd = C // H
    scale = 0.25 / math.sqrt(hd)
    # bf16 output recommended when the surrounding model runs bf16 (halves the
    # proj write bytes); default keeps the module's input dtype.
    out_dtype = x.dtype if out_dtype is None else out_dtype

    w_qkv = params["w_qkv"].astype(jnp.float32)     # (3C, C) PyTorch (out, in)
    q_bias = params["q_bias"].astype(jnp.float32)   # (C,)
    v_bias = params["v_bias"].astype(jnp.float32)   # (C,)
    w_proj = params["w_proj"].astype(jnp.float32)   # (C, C) PyTorch (out, in)
    b_proj = params["b_proj"].astype(jnp.float32)   # (C,)

    # One-time (trace-level) weight prep: transpose to input-major so the
    # kernels run plain NN matmuls, and fold the attention scale into q.
    w_qkv_t = w_qkv.T                               # (C, 3C): [q | k | v] cols
    w_qkv_t = w_qkv_t.at[:, :C].multiply(scale)
    b3 = jnp.stack([q_bias * scale, jnp.zeros_like(q_bias), v_bias])[:, None, :]
    w_proj_t = w_proj.T                             # (C, C) input-major

    # bf16 MXU operands; biases / softmax stats / accumulators stay f32.
    x_bf = x.astype(jnp.bfloat16)
    w_qkv_bf = w_qkv_t.astype(jnp.bfloat16)
    w_proj_bf = w_proj_t.astype(jnp.bfloat16)

    # Additive attention bias: must broadcast over batch & heads.
    if attn_bias is None:
        bias2d = jnp.zeros((L, L), jnp.bfloat16)
    else:
        ab = jnp.asarray(attn_bias)
        assert ab.shape[-2:] == (L, L) and all(int(d) == 1 for d in ab.shape[:-2]), (
            f"attn_bias must be broadcastable as (1, 1, L, L); got {ab.shape}")
        # TODO(synk): support per-batch / per-head bias blocks via the index_map.
        bias2d = ab.reshape(L, L).astype(jnp.bfloat16)   # half the L^2 traffic
    # TODO(synk): when the bias is known-causal, generate the mask in-kernel
    # with lax.broadcasted_iota instead of streaming an LxL tensor per (b, g).

    vmem_limit = _vmem_limit_bytes()

    # Tiles: full extent at toy sizes, bf16-friendly aligned divisors otherwise.
    TL = _pick_tile(L, 512, 16, min_align=8)   # row tile for the linear layers
    TQ = _pick_tile(L, 512, 16, min_align=8)   # query tile
    TK = _pick_tile(L, 1024, 128)              # key/value tile (bias lane dim)

    # Contraction tile for the linear layers: keep the whole (C, 3C) weight
    # resident when it fits comfortably, otherwise stream C-slabs with an f32
    # accumulator (v7x 64 MiB VMEM / very large embed dims).
    if 2 * (C * 3 * C * 2) <= vmem_limit // 3:     # double-buffered bf16 weight
        TCK = C
    else:
        TCK = _pick_tile(C, 512, 128)
    # TODO(synk): single-buffer the grid-invariant weight BlockSpecs
    # (pipeline_mode=pl.Buffered(1)) to halve their VMEM footprint on v7x.

    hb = _pick_heads_per_step(H, hd, C)        # heads per attention grid step
    hg = H // hb

    linear_cparams = pltpu.CompilerParams(
        dimension_semantics=("parallel", "parallel", "arbitrary"),
        vmem_limit_bytes=vmem_limit)

    # ---- 1) fused QKV projection: one (TL, TCK) x (TCK, 3C) NN matmul per
    #         step, f32 accumulation over C, emitted as (B, 3, L, C) bf16.
    qkv = pl.pallas_call(
        functools.partial(_qkv_kernel, C=C),
        out_shape=jax.ShapeDtypeStruct((B, 3, L, C), jnp.bfloat16),
        grid=(B, L // TL, C // TCK),
        in_specs=[
            pl.BlockSpec((None, TL, TCK), lambda b, l, k: (b, l, k)),
            pl.BlockSpec((TCK, 3 * C), lambda b, l, k: (k, 0)),
            pl.BlockSpec((3, 1, C), lambda b, l, k: (0, 0, 0)),
        ],
        out_specs=pl.BlockSpec((None, 3, TL, C), lambda b, l, k: (b, 0, l, 0)),
        scratch_shapes=[pltpu.VMEM((TL, 3 * C), jnp.float32)],
        compiler_params=linear_cparams,
    )(x_bf, w_qkv_bf, b3)

    # ---- 2) flash-style attention: hb heads per step, online softmax over the
    #         KV grid axis, lane-dense (TQ, hb*hd) slabs written straight into
    #         the (B, L, C) output (the (B,H,L,hd)->(B,L,C) reorg is pure
    #         BlockSpec indexing).
    attn_out = pl.pallas_call(
        functools.partial(_attn_kernel, hd=hd, hb=hb),
        out_shape=jax.ShapeDtypeStruct((B, L, C), jnp.bfloat16),
        grid=(B, hg, L // TQ, L // TK),
        in_specs=[
            pl.BlockSpec((None, None, TQ, hb * hd),
                         lambda b, g, qi, ki: (b, 0, qi, g)),
            pl.BlockSpec((None, None, TK, hb * hd),
                         lambda b, g, qi, ki: (b, 1, ki, g)),
            pl.BlockSpec((None, None, TK, hb * hd),
                         lambda b, g, qi, ki: (b, 2, ki, g)),
            pl.BlockSpec((TQ, TK), lambda b, g, qi, ki: (qi, ki)),
        ],
        out_specs=pl.BlockSpec((None, TQ, hb * hd),
                               lambda b, g, qi, ki: (b, qi, g)),
        scratch_shapes=[
            pltpu.VMEM((hb, TQ, 1), jnp.float32),    # running max  m (head-major)
            pltpu.VMEM((hb, TQ, 1), jnp.float32),    # running sum  l (head-major)
            pltpu.VMEM((hb, TQ, hd), jnp.float32),   # running accumulator
        ],
        compiler_params=pltpu.CompilerParams(
            dimension_semantics=("parallel", "parallel", "parallel",
                                 "arbitrary"),
            vmem_limit_bytes=vmem_limit),
    )(qkv, qkv, qkv, bias2d)

    # ---- 3) output projection: (B,L,C) @ Wp + b_proj with f32 accumulation.
    out = pl.pallas_call(
        _proj_kernel,
        out_shape=jax.ShapeDtypeStruct((B, L, C), out_dtype),
        grid=(B, L // TL, C // TCK),
        in_specs=[
            pl.BlockSpec((None, TL, TCK), lambda b, l, k: (b, l, k)),
            pl.BlockSpec((TCK, C), lambda b, l, k: (k, 0)),
            pl.BlockSpec((1, C), lambda b, l, k: (0, 0)),
        ],
        out_specs=pl.BlockSpec((None, TL, C), lambda b, l, k: (b, l, 0)),
        scratch_shapes=[pltpu.VMEM((TL, C), jnp.float32)],
        compiler_params=linear_cparams,
    )(attn_out, w_proj_bf, b_proj.reshape(1, C))

    # attn_drop / proj_drop are identity in eval mode.
    return out


# ---------------------------------------------------------------- reference

def reference_forward(x, attn_bias, params, num_heads):
    B, L, C = x.shape
    H = num_heads
    hd = C // H
    scale = 0.25 / math.sqrt(hd)
    bias_cat = jnp.concatenate(
        [params["q_bias"], jnp.zeros_like(params["q_bias"]), params["v_bias"]])
    qkv = x @ params["w_qkv"].T + bias_cat
    qkv = qkv.reshape(B, L, 3, H, hd).transpose(2, 0, 3, 1, 4)
    q, k, v = qkv[0], qkv[1], qkv[2]
    s = (q * scale) @ jnp.swapaxes(k, -1, -2) + attn_bias
    p = jax.nn.softmax(s, axis=-1)
    oup = (p @ v).transpose(0, 2, 1, 3).reshape(B, L, C)
    return oup @ params["w_proj"].T + params["b_proj"]


# --------------------------------------------------------------------- main

if __name__ == "__main__":
    B, L, C, H = 2, 16, 32, 4  # batch, seq, embed_dim, num_heads (head_dim=8)

    key = jax.random.PRNGKey(0)
    kx, kw1, kw2, kb2, kq, kv = jax.random.split(key, 6)

    x = jax.random.normal(kx, (B, L, C), dtype=jnp.float32)

    params = {
        "w_qkv": 0.02 * jax.random.normal(kw1, (3 * C, C), dtype=jnp.float32),
        "q_bias": 0.05 * jax.random.normal(kq, (C,), dtype=jnp.float32),
        "v_bias": 0.05 * jax.random.normal(kv, (C,), dtype=jnp.float32),
        "w_proj": 0.02 * jax.random.normal(kw2, (C, C), dtype=jnp.float32),
        "b_proj": 0.01 * jax.random.normal(kb2, (C,), dtype=jnp.float32),
    }

    # causal additive attention bias, shape (1, 1, L, L)
    causal = jnp.tril(jnp.ones((L, L), dtype=bool))
    attn_bias = jnp.where(causal, 0.0, -1e30).astype(jnp.float32)[None, None]

    out = self_attention_forward(x, attn_bias, params, num_heads=H)
    out = jax.block_until_ready(out)

    ref = reference_forward(x, attn_bias, params, num_heads=H)
    # bf16 MXU operands + bf16 intermediates -> loosened tolerance vs f32 ref.
    np.testing.assert_allclose(np.asarray(out), np.asarray(ref),
                               rtol=5e-2, atol=1e-3)

    print("KERNEL_OK")
</pallas_src>

<mosaic_0001>
module attributes {stable_mosaic.version = 11 : i64} {
  func.func @_qkv_kernel(%arg0: i32, %arg1: i32, %arg2: i32, %arg3: memref<1x16x32xbf16, #tpu.memory_space<vmem>>, %arg4: memref<32x96xbf16, #tpu.memory_space<vmem>>, %arg5: memref<3x1x32xf32, #tpu.memory_space<vmem>>, %arg6: memref<1x3x16x32xbf16, #tpu.memory_space<vmem>>, %arg7: memref<16x96xf32, #tpu.memory_space<vmem>>) attributes {dimension_semantics = [#tpu.dimension_semantics<parallel>, #tpu.dimension_semantics<parallel>, #tpu.dimension_semantics<arbitrary>], iteration_bounds = array<i64: 2, 1, 1>, scalar_prefetch = 0 : i64, scratch_operands = 1 : i64, tpu.core_type = #tpu.core_type<tc>, window_params = [{transform_indices = @transform_0, window_bounds = array<i64: 1, 16, 32>}, {transform_indices = @transform_1, window_bounds = array<i64: 32, 96>}, {pipeline_mode = #tpu.pipeline_mode<synchronous>, transform_indices = @transform_2, window_bounds = array<i64: 3, 1, 32>}, {transform_indices = @transform_3, window_bounds = array<i64: 1, 3, 16, 32>}]} {
    %c0_i32 = arith.constant 0 : i32
    %0 = arith.cmpi eq, %arg2, %c0_i32 : i32
    %1 = arith.extui %0 : i1 to i32
    %c0_i32_0 = arith.constant 0 : i32
    %2 = arith.cmpi ne, %1, %c0_i32_0 : i32
    scf.if %2 {
      %cst_11 = arith.constant 0.000000e+00 : f32
      %13 = vector.broadcast %cst_11 : f32 to vector<16x96xf32>
      %c0_12 = arith.constant 0 : index
      %c0_13 = arith.constant 0 : index
      %14 = vector.load %arg7[%c0_12, %c0_13] : memref<16x96xf32, #tpu.memory_space<vmem>>, vector<16x96xf32>
      tpu.vector_store %arg7[%c0_12, %c0_13], %13 {strides = array<i32>} : memref<16x96xf32, #tpu.memory_space<vmem>>, vector<16x96xf32>,
    } else {
    }
    %c0 = arith.constant 0 : index
    %c0_1 = arith.constant 0 : index
    %3 = vector.load %arg7[%c0, %c0_1] : memref<16x96xf32, #tpu.memory_space<vmem>>, vector<16x96xf32>
    %c0_2 = arith.constant 0 : index
    %c0_3 = arith.constant 0 : index
    %c0_4 = arith.constant 0 : index
    %4 = vector.load %arg3[%c0_2, %c0_3, %c0_4] : memref<1x16x32xbf16, #tpu.memory_space<vmem>>, vector<1x16x32xbf16>
    %5 = vector.shape_cast %4 : vector<1x16x32xbf16> to vector<16x32xbf16>
    %c0_5 = arith.constant 0 : index
    %c0_6 = arith.constant 0 : index
    %6 = vector.load %arg4[%c0_5, %c0_6] : memref<32x96xbf16, #tpu.memory_space<vmem>>, vector<32x96xbf16>
    %cst = arith.constant dense<0.000000e+00> : vector<16x96xf32>
    %7 = tpu.matmul %5, %6, %cst {dimension_numbers = #tpu.dot_dimension_numbers<[1], [0], [0], [1], [0, 0, 1, 1], [], []>} : vector<16x32xbf16>, vector<32x96xbf16>, vector<16x96xf32> -> vector<16x96xf32>
    %8 = arith.addf %3, %7 : vector<16x96xf32>
    %c0_7 = arith.constant 0 : index
    %c0_8 = arith.constant 0 : index
    %9 = vector.load %arg7[%c0_7, %c0_8] : memref<16x96xf32, #tpu.memory_space<vmem>>, vector<16x96xf32>
    tpu.vector_store %arg7[%c0_7, %c0_8], %8 {strides = array<i32>} : memref<16x96xf32, #tpu.memory_space<vmem>>, vector<16x96xf32>,
    %c0_i32_9 = arith.constant 0 : i32
    %10 = arith.cmpi eq, %arg2, %c0_i32_9 : i32
    %11 = arith.extui %10 : i1 to i32
    %c0_i32_10 = arith.constant 0 : i32
    %12 = arith.cmpi ne, %11, %c0_i32_10 : i32
    scf.if %12 {
      %c0_11 = arith.constant 0 : index
      %c0_12 = arith.constant 0 : index
      %13 = vector.load %arg7[%c0_11, %c0_12] : memref<16x96xf32, #tpu.memory_space<vmem>>, vector<16x96xf32>
      %14 = vector.extract_strided_slice %13 {offsets = [0, 0], sizes = [16, 32], strides = [1, 1]} : vector<16x96xf32> to vector<16x32xf32>
      %c0_13 = arith.constant 0 : index
      %c0_14 = arith.constant 0 : index
      %c0_15 = arith.constant 0 : index
      %15 = vector.load %arg5[%c0_13, %c0_14, %c0_15] : memref<3x1x32xf32, #tpu.memory_space<vmem>>, vector<1x1x32xf32>
      %16 = vector.shape_cast %15 : vector<1x1x32xf32> to vector<1x32xf32>
      %17 = vector.broadcast %16 : vector<1x32xf32> to vector<16x32xf32>
      %18 = arith.addf %14, %17 : vector<16x32xf32>
      %19 = arith.truncf %18 : vector<16x32xf32> to vector<16x32xbf16>
      %c0_16 = arith.constant 0 : index
      %c0_17 = arith.constant 0 : index
      %c0_18 = arith.constant 0 : index
      %c0_19 = arith.constant 0 : index
      %20 = vector.load %arg6[%c0_16, %c0_17, %c0_18, %c0_19] : memref<1x3x16x32xbf16, #tpu.memory_space<vmem>>, vector<1x1x16x32xbf16>
      %21 = vector.shape_cast %20 : vector<1x1x16x32xbf16> to vector<16x32xbf16>
      %22 = vector.shape_cast %19 : vector<16x32xbf16> to vector<1x1x16x32xbf16>
      tpu.vector_store %arg6[%c0_16, %c0_17, %c0_18, %c0_19], %22 {strides = array<i32>} : memref<1x3x16x32xbf16, #tpu.memory_space<vmem>>, vector<1x1x16x32xbf16>,
      %23 = vector.extract_strided_slice %13 {offsets = [0, 32], sizes = [16, 32], strides = [1, 1]} : vector<16x96xf32> to vector<16x32xf32>
      %c1 = arith.constant 1 : index
      %c0_20 = arith.constant 0 : index
      %c0_21 = arith.constant 0 : index
      %24 = vector.load %arg5[%c1, %c0_20, %c0_21] : memref<3x1x32xf32, #tpu.memory_space<vmem>>, vector<1x1x32xf32>
      %25 = vector.shape_cast %24 : vector<1x1x32xf32> to vector<1x32xf32>
      %26 = vector.broadcast %25 : vector<1x32xf32> to vector<16x32xf32>
      %27 = arith.addf %23, %26 : vector<16x32xf32>
      %28 = arith.truncf %27 : vector<16x32xf32> to vector<16x32xbf16>
      %c0_22 = arith.constant 0 : index
      %c1_23 = arith.constant 1 : index
      %c0_24 = arith.constant 0 : index
      %c0_25 = arith.constant 0 : index
      %29 = vector.load %arg6[%c0_22, %c1_23, %c0_24, %c0_25] : memref<1x3x16x32xbf16, #tpu.memory_space<vmem>>, vector<1x1x16x32xbf16>
      %30 = vector.shape_cast %29 : vector<1x1x16x32xbf16> to vector<16x32xbf16>
      %31 = vector.shape_cast %28 : vector<16x32xbf16> to vector<1x1x16x32xbf16>
      tpu.vector_store %arg6[%c0_22, %c1_23, %c0_24, %c0_25], %31 {strides = array<i32>} : memref<1x3x16x32xbf16, #tpu.memory_space<vmem>>, vector<1x1x16x32xbf16>,
      %32 = vector.extract_strided_slice %13 {offsets = [0, 64], sizes = [16, 32], strides = [1, 1]} : vector<16x96xf32> to vector<16x32xf32>
      %c2 = arith.constant 2 : index
      %c0_26 = arith.constant 0 : index
      %c0_27 = arith.constant 0 : index
      %33 = vector.load %arg5[%c2, %c0_26, %c0_27] : memref<3x1x32xf32, #tpu.memory_space<vmem>>, vector<1x1x32xf32>
      %34 = vector.shape_cast %33 : vector<1x1x32xf32> to vector<1x32xf32>
      %35 = vector.broadcast %34 : vector<1x32xf32> to vector<16x32xf32>
      %36 = arith.addf %32, %35 : vector<16x32xf32>
      %37 = arith.truncf %36 : vector<16x32xf32> to vector<16x32xbf16>
      %c0_28 = arith.constant 0 : index
      %c2_29 = arith.constant 2 : index
      %c0_30 = arith.constant 0 : index
      %c0_31 = arith.constant 0 : index
      %38 = vector.load %arg6[%c0_28, %c2_29, %c0_30, %c0_31] : memref<1x3x16x32xbf16, #tpu.memory_space<vmem>>, vector<1x1x16x32xbf16>
      %39 = vector.shape_cast %38 : vector<1x1x16x32xbf16> to vector<16x32xbf16>
      %40 = vector.shape_cast %37 : vector<16x32xbf16> to vector<1x1x16x32xbf16>
      tpu.vector_store %arg6[%c0_28, %c2_29, %c0_30, %c0_31], %40 {strides = array<i32>} : memref<1x3x16x32xbf16, #tpu.memory_space<vmem>>, vector<1x1x16x32xbf16>,
    } else {
    }
    return
  }
  func.func @transform_0(%arg0: i32, %arg1: i32, %arg2: i32) -> (i32, i32, i32) {
    %c0_i32 = arith.constant 0 : i32
    return %arg0, %arg1, %arg2 : i32, i32, i32
  }
  func.func @transform_1(%arg0: i32, %arg1: i32, %arg2: i32) -> (i32, i32) {
    %c0_i32 = arith.constant 0 : i32
    %c0_i32_0 = arith.constant 0 : i32
    return %arg2, %c0_i32 : i32, i32
  }
  func.func @transform_2(%arg0: i32, %arg1: i32, %arg2: i32) -> (i32, i32, i32) {
    %c0_i32 = arith.constant 0 : i32
    %c0_i32_0 = arith.constant 0 : i32
    %c0_i32_1 = arith.constant 0 : i32
    %c0_i32_2 = arith.constant 0 : i32
    return %c0_i32, %c0_i32_0, %c0_i32_1 : i32, i32, i32
  }
  func.func @transform_3(%arg0: i32, %arg1: i32, %arg2: i32) -> (i32, i32, i32, i32) {
    %c0_i32 = arith.constant 0 : i32
    %c0_i32_0 = arith.constant 0 : i32
    %c0_i32_1 = arith.constant 0 : i32
    return %arg0, %c0_i32, %arg1, %c0_i32_0 : i32, i32, i32, i32
  }
}

</mosaic_0001>

<bundles_post_ra>
// kernel: tpu_custom_call.1
= control target key start
LH: loop header
LB: loop body
LE: loop exit
PB: predicated region body
PF: predicated region fallthrough
CT: control target
= control target key end

     0   :  { %8 = vsyncpa [#allocation4], 0  ;;  %s1020_s0 = inlined_call_operand.hbm [shape: bf16[2,16,32], index: 0, kind: input, shape index: {}]   ;;  %s1021_s1 = inlined_call_operand.hbm [shape: bf16[32,96], index: 1, kind: input, shape index: {}]   ;;  %s1022_s2 = inlined_call_operand.hbm [shape: f32[3,1,32], index: 2, kind: input, shape index: {}]   ;;  %s1023_s3 = inlined_call_operand.hbm [shape: bf16[2,3,16,32], index: 3, kind: output, shape index: {}]  }
   0x1   :  { %10 = vsyncpa [#allocation4 + $0x1], 0 }
   0x2   :  { %11 = vsyncpa [#allocation7], 0 }
   0x3   :  { %12 = vsyncpa [#allocation5], 0 }
   0x4   :  { %14 = vsyncpa [#allocation5 + $0x1], 0  ;;  %s852_s12 = smov 0   ;;  %s854_s13 = smov 0  }
   0x5   :  { %s856_s14 = smov 0   ;;  %s858_s15 = smov 0  }
   0x6   :  { %s860_s16 = smov 0   ;;  %s862_s17 = smov 0  }
   0x7 LB: > { %s509_s18 = sadd.s32 4294967295, %s819_s17   ;;  %s510_s19 = sadd.s32 4294967294, %s819_s17   ;;  %s819_s17 = sphi %s862_s17, %s20_s17   ;;  %s815_s16 = sphi %s860_s16, %s1033_s16   ;;  %s811_s15 = sphi %s858_s15, %s1032_s15   ;;  %s807_s14 = sphi %s856_s14, %s1031_s14   ;;  %s803_s13 = sphi %s854_s13, %s1030_s13   ;;  %s799_s12 = sphi %s852_s12, %s1029_s12  }
   0x8   : > { %p63_p0 = scmp.ne.s32.totalorder %s803_s13, %s799_s12  ;;  %p888_p1 = scmp.eq.s32.totalorder %s509_s18, 0 }
   0x9   : > { %p142_p2 = scmp.eq.s32.totalorder %s510_s19, 1  ;;  %p511_p4 = scmp.ge.s32.totalorder %s819_s17, 1 }
   0xa   : > { %p894_p3 = por %p888_p1, %p63_p0  ;;  %p149_p6 = scmp.lt.s32.totalorder %s819_s17, 3 }
   0xb   : > { %p899_p5 = por %p142_p2, %p63_p0  ;;  %s163_s25 = sshll.u32 %s1021_s1, 4  ;;  %s164_s25 = int_to_ptr.hbm [resolvable:$true] %s163_s25 }
   0xc   : > { %p907_p7 = pnand %p511_p4, %p149_p6  ;;  %s821_s27 = smov [#allocation6]  }
   0xd   : > { %s165_s28 = sshll.u32 %s821_s27, 4  ;;  %p514_p10 = scmp.ge.s32.totalorder %s819_s17, 2  ;;  %s166_s28 = int_to_ptr.vmem [resolvable:$true] %s165_s28 }
   0xe   : > { %p560_p8 = pneg %p907_p7  ;;  %s177_s4 = sshll.u32 %s1022_s2, 4  ;;  %s178_s4 = int_to_ptr.hbm [resolvable:$true] %s177_s4 }
   0xf   : > { %s822_s5 = smov 64   ;;  %s823_s6 = smov 4  }
  0x10   : > { %p561_p9 = pnand %p560_p8, %p888_p1  ;;  %s824_s7 = smov [#allocation8]  }
  0x11   : > { %s179_s8 = sshll.u32 %s824_s7, 4  ;;  %s825_s9 = smov 16   ;;  %s180_s8 = int_to_ptr.vmem [resolvable:$true] %s179_s8 }
  0x12   : > { %563 = dma.hbm_to_vmem [thread:$0]  (!%p561_p9), %s164_s25, 256, %s166_s28, [#allocation7], %s822_s5, %s822_s5, %s823_s6  }
  0x13   : > { %s826_s10 = smov 1   ;;  %p136_p11 = scmp.eq.s32.totalorder %s509_s18, 1 }
  0x14   : > { %566 = dma.hbm_to_vmem [thread:$0]  (!%p561_p9), %s178_s4, 48, %s180_s8, [#allocation7], %s825_s9, %s825_s9, %s826_s10  }
  0x15   : > { %s39_s11 = sadd.s32 1, %s815_s16  ;;  %s50_s19 = sadd.s32 1, %s807_s14 }
  0x16   : > { %p41_p12 = scmp.ge.s32.totalorder %s39_s11, 2  ;;  %p57_p13 = scmp.ne.s32.totalorder %s807_s14, %s803_s13 }
  0x17   : > { %p58_p0 = scmp.eq.s32.totalorder %s819_s17, 0  ;;  %p577_p4 = scmp.lt.s32.totalorder %s819_s17, 2 }
  0x18   : > { %s1035_s11 = smov (%p41_p12, %s39_s11), 0  ;;  %p931_p2 = por %p136_p11, %p57_p13 }
  0x19   : > { %s43_s24 = ssub.s32 %s815_s16, %s1035_s11  ;;  %s193_s25 = sand.u32 1, %s807_s14  }
  0x1a   : > { %p48_p6 = scmp.eq.s32.totalorder %s43_s24, 0  ;;  %p59_p8 = por %p58_p0, %p57_p13 }
  0x1b   : > { %s515_s27 = sshll.u32 %s193_s25, 3  ;;  %s542_s18 = sshll.u32 %s815_s16, 3 }
  0x1c   : > { %s941_s28 = scalar_select %p48_p6, %s807_s14, %s50_s19  }
  0x1d   : > { %s205_s4 = scalar_lea.hbm %s1020_s0, %s542_s18  ;;  %s197_s8 = scalar_lea.vmem [#allocation3], %s515_s27 }
  0x1e   : > { %s206_s7 = sshll.u32 %s205_s4, 4  ;;  %s208_s9 = sshll.u32 %s197_s8, 4  ;;  %s207_s7 = int_to_ptr.hbm [resolvable:$true] %s206_s7  ;;  %s209_s9 = int_to_ptr.vmem [resolvable:$true] %s208_s9 }
  0x1f   : > { %p568_p9 = pnand %p577_p4, %p59_p8  ;;  %s194_s10 = scalar_lea.sflag [#allocation4], %s193_s25 }
  0x20   : > { %220 = sbr.rel (%p907_p7) target bundleno = 315 (0x13b), region = 32  ;;  %s954_s19 = sand.u32 (!%p907_p7), 1, %s803_s13  }
  0x21   : > { %570 = dma.hbm_to_vmem [thread:$0]  (!%p568_p9), %s207_s7, 128, %s209_s9, %s194_s10, %s822_s5, %s822_s5, %s823_s6  }
  0x22   : > { %s519_s24 = sshll.u32 (!%p907_p7), %s954_s19, 3  ;;  %s223_s27 = scalar_lea.sflag (!%p907_p7), [#allocation4], %s954_s19 }
  0x23   : > { %s226_s18 = scalar_lea.vmem (!%p907_p7), [#allocation3], %s519_s24 }
  0x25   : > { %786 = dma.done.wait (%p894_p3), %s223_s27, 128  }
  0x26   : > { %788 = vsyncadd (%p894_p3), %s223_s27, 4294967168 }
  0x27   : > { %790 = dma.done.wait (%p888_p1), [#allocation7], 304  }
  0x28   : > { %792 = vsyncadd (%p888_p1), [#allocation7], 4294966992  ;;  %vm268_vm0 = vcmask 785408   ;;  %v827_v0 = vmov 0.0   ;;  %v545_v1 = vld [vmem:[#allocation6 + $0x8] sm:$0xff]  ;;  %v544_v3 = vld [vmem:[#allocation6] sm:$0xff] }
  0x29   : > { %269 = vst.msk [vmem:[#allocation2] sm:$0xff] %vm268_vm0, %v827_v0  ;;  %v640_v2 = vld [vmem:[#allocation8 + $0x1] ss:$0 sm:$0xff]  ;;  %306 = vmatpush.bf16.msra.mxu0 %v545_v1  ;;  %s828_s26 = smov 32   ;;  %vm296_vm1 = vcmask 261120   ;;  %s829_s20 = smov 64  }
  0x2a   : > { %270 = vst.msk [vmem:[#allocation2 + $0x8] sm:$0xff] %vm268_vm0, %v827_v0  ;;  %339 = vrot.lane.b32.xlu0 %v640_v2, %s828_s26  ;;  %v543_v4 = vld [vmem:[%s226_s18] sm:$0xff]  ;;  %s546_s21 = smul.u32 24, %s954_s19  ;;  %vm332_vm2 = vcmask 257024   ;;  %s830_s5 = smov 96  }
  0x2b   : > { %v641_v5 = vld [vmem:[#allocation8 + $0x2] ss:$0 sm:$0xff]  ;;  %v642_v11 = vld [vmem:[#allocation8] ss:$0 sm:$0xff]  ;;  %s547_s25 = smul.u32 24, %s811_s15  ;;  %s380_s9 = scalar_lea.sflag [#allocation5], %s954_s19 }
  0x2c   : > { %s259_s6 = scalar_lea.vmem [#allocation9], %s546_s21  ;;  %s753_s18 = scalar_lea.hbm %s1023_s3, 48 }
  0x2d   : > { %307 = vmatpush.bf16.msra.mxu0 %v544_v3  ;;  %s393_s4 = scalar_lea.hbm %s1023_s3, %s547_s25  ;;  %s394_s7 = sshll.u32 %s259_s6, 4  ;;  %s395_s7 = int_to_ptr.vmem [resolvable:$true] %s394_s7 }
  0x2e   : > { %s396_s8 = sshll.u32 %s393_s4, 4  ;;  %s397_s8 = int_to_ptr.hbm [resolvable:$true] %s396_s8 }
  0x2f   : > { %s747_s10 = sshra.s32 %s397_s8, 4  ;;  %s748_s10 = int_to_ptr.hbm [resolvable:$true] %s747_s10 }
  0x30   : > { %534 = vmatmul.msk.bf16.vlgmr.msra.gmra.mxu0 %vm296_vm1, %v543_v4  ;;  %v271_v6 = vld [vmem:[#allocation2] sm:$0xff]  ;;  %s749_s24 = scalar_lea.hbm %s748_s10, 24  ;;  %p754_p11 = scmp.lt.s32.totalorder %s748_s10, %s1023_s3 }
  0x31   : > { %v272_v10 = vld [vmem:[#allocation2 + $0x8] sm:$0xff]  ;;  %p750_p1 = scmp.ne.s32.totalorder %s748_s10, %s749_s24  ;;  %p755_p12 = scmp.lt.s32.totalorder %s753_s18, %s749_s24 }
  0x32   : > { %361 = vrot.lane.b32.xlu0 %v641_v5, %s829_s20 }
  0x33   : > { %p751_p3 = pnand %p750_p1, %p931_p2  ;;  %p756_p13 = por %p755_p12, %p754_p11 }
  0x35   : > { %p752_p7 = pneg %p751_p3 }
  0x37   : > { %p757_p0 = pnand %p756_p13, %p752_p7 }
  0x9c   : > { %v340_v7 = vpop.permute.xlu0 %339 }
  0xa4   : > { %v362_v13 = vpop.permute.xlu0 %361 }
  0xad   : > { %v309_v8 = vpop.f32.mrf.mxu0 }
  0xae   : > { %v314_v9 = vadd.f32 %v309_v8, %v271_v6 }
  0xb0   : > { %317 = vst.msk [vmem:[#allocation2] sm:$0xff] %vm268_vm0, %v314_v9 }
  0xb5   : > { %v311_v12 = vpop.f32.mrf.mxu0 }
  0xb6   : > { %v315_v14 = vadd.f32 %v311_v12, %v272_v10 }
  0xb7   : > { %v322_v15 = vld [vmem:[#allocation2] sm:$0xff] }
  0xb8   : > { %v328_v16 = vadd.f32 %v642_v11, %v322_v15  ;;  %v342_v17 = vadd.f32 %v340_v7, %v322_v15  ;;  %318 = vst.msk [vmem:[#allocation2 + $0x8] sm:$0xff] %vm268_vm0, %v315_v14  ;;  %v364_v18 = vadd.f32 %v362_v13, %v322_v15 }
  0xba   : > { %v330_v19 = vpack.c.bf16 %v328_v16, %v328_v16  ;;  %v366_v20 = vpack.c.bf16 %v364_v18, %v364_v18  ;;  %v344_v21 = vpack.c.bf16 %v342_v17, %v342_v17 }
  0xbc   : > { %370 = vrot.lane.b32.xlu2 %v366_v20, %s829_s20  ;;  %348 = vrot.lane.b32.xlu1 %v344_v21, %s830_s5  ;;  %333 = vst.msk [vmem:[%s259_s6] sm:$0xf] %vm332_vm2, %v330_v19 }
  0xbf   : > { %v323_v22 = vld [vmem:[#allocation2 + $0x8] sm:$0xff] }
  0xc0   : > { %v329_v23 = vadd.f32 %v642_v11, %v323_v22  ;;  %v365_v24 = vadd.f32 %v362_v13, %v323_v22  ;;  %v343_v25 = vadd.f32 %v340_v7, %v323_v22 }
  0xc2   : > { %v331_v26 = vpack.c.bf16 %v329_v23, %v329_v23  ;;  %v367_v27 = vpack.c.bf16 %v365_v24, %v365_v24  ;;  %v345_v28 = vpack.c.bf16 %v343_v25, %v343_v25 }
  0xc4   : > { %372 = vrot.lane.b32.xlu2 %v367_v27, %s829_s20  ;;  %350 = vrot.lane.b32.xlu1 %v345_v28, %s830_s5  ;;  %334 = vst.msk [vmem:[%s259_s6 + $0x4] sm:$0xf] %vm332_vm2, %v331_v26 }
 0x116   : > { %v371_v29 = vpop.permute.xlu2 %370 }
 0x117   : > { %537 = vst.msk [vmem:[%s259_s6 + $0x10] sm:$0xf] %vm332_vm2, %v371_v29 }
 0x11e   : > { %v373_v30 = vpop.permute.xlu2 %372 }
 0x11f   : > { %538 = vst.msk [vmem:[%s259_s6 + $0x14] sm:$0xf] %vm332_vm2, %v373_v30 }
 0x12e   : > { %v349_v31 = vpop.permute.xlu1 %348 }
 0x12f   : > { %535 = vst.msk [vmem:[%s259_s6 + $0x8] sm:$0xf] %vm332_vm2, %v349_v31 }
 0x136   : > { %v351_v32 = vpop.permute.xlu1 %350 }
 0x137   : > { %536 = vst.msk [vmem:[%s259_s6 + $0xc] sm:$0xf] %vm332_vm2, %v351_v32 }
 0x138   : > { %760 = shalt.err (!%p757_p0)
}
 0x139   : > { %s831_s19 = smov 4  }
 0x13a   : > { %558 = dma.vmem_to_hbm [thread:$0]  (%p931_p2), %s395_s7, 384, %s397_s8, %s380_s9, %s829_s20, %s829_s20, %s831_s19  }
 0x13b PF: > { %s411_s5 = sand.u32 1, %s799_s12   ;;  %p572_p4 = pnand %p514_p10, %p899_p5 }
 0x13c   : > { %s412_s6 = scalar_lea.sflag [#allocation5], %s411_s5 }
 0x13d   : > { %p573_p6 = pneg %p572_p4 }
 0x13f   : > { %794 = dma.done.wait (%p573_p6), %s412_s6, 384  }
 0x140   : > { %796 = vsyncadd (%p573_p6), %s412_s6, 4294966912  ;;  %s20_s17 = sadd.s32 1, %s819_s17   ;;  %s1029_s12 = smov %s803_s13 }
 0x141   : > { %p17_p8 = scmp.ge.s32.totalorder %s20_s17, 4   ;;  %s1030_s13 = smov %s807_s14 }
 0x142   : > { %s1031_s14 = smov %s941_s28  ;;  %s1032_s15 = smov %s815_s16 }
 0x143   : > { %s1033_s16 = smov %s1035_s11  ;;  %19 = sbr.rel (!%p17_p8) target bundleno = 7 (0x7), region = 98 }
 0x148   :  { %418 = vsyncpa [#allocation4], 1 }
 0x149   :  { %420 = vsyncpa [#allocation4 + $0x1], 1 }
 0x14a   :  { %421 = vsyncpa [#allocation7], 1 }
 0x14b   :  { %422 = vsyncpa [#allocation5], 1 }
 0x14c   :  { %424 = vsyncpa [#allocation5 + $0x1], 1 }

</bundles_post_ra>
